<compile_context>
chip_gen: v6e
topology: v6e:2x2x1
jax: 0.10.0
libtpu: 0.0.40
codegen_flags: <defaults>
</compile_context>

<pallas_src>
import functools

import numpy as np
import jax
import jax.numpy as jnp
from jax.experimental import pallas as pl
from jax.experimental.pallas import tpu as pltpu


def _bigru_kernel(x_ref, gxtab_ref, whzr_ref, whc_ref, wo_ref, bo_ref, out_ref,
                  *, T, B):
    V = gxtab_ref.shape[0]
    H = whc_ref.shape[0] // 2
    H2 = 2 * H

    # ---- In-kernel embedding-path "gather": one-hot(x) @ pre-folded table. ----
    # gx row layout (per token): [z1, r1, c1(0:H), z2, r2, c2(0:H)]  (biases folded)
    ids = x_ref[...]                                                  # (T*B, 1) int32
    iota_v = jax.lax.broadcasted_iota(jnp.int32, (T * B, V), 1)
    onehot = (ids == iota_v).astype(jnp.float32)                      # (T*B, V)
    gx = jnp.dot(onehot, gxtab_ref[...],
                 preferred_element_type=jnp.float32)                  # (T*B, 2*(2+H))

    whzr = whzr_ref[...]            # (2H, 4)  block-diag: cols [z1 r1 | z2 r2]
    whc = whc_ref[...]              # (2H, 2H) block-diag candidate weights
    fwd_mask = jax.lax.broadcasted_iota(jnp.int32, (B, H2), 1) < H    # hoisted

    hh = jnp.zeros((B, H2), jnp.float32)     # fused state [h1 | h2]
    th_list = []

    # Fully-unrolled recurrence; the PyTorch `break` skips the final update, so we
    # only run T-1 updates and append the last pre-update state afterwards.
    for t in range(T - 1):
        th_list.append(hh)

        fw = gx[t * B:(t + 1) * B]                     # fwd direction: token t
        bw = gx[(T - 1 - t) * B:(T - t) * B]           # bwd direction: token T-1-t
        gxzr_t = jnp.concatenate([fw[:, 0:2], bw[:, 2 + H:4 + H]], axis=-1)       # (B,4)
        gxc_t = jnp.concatenate([fw[:, 2:2 + H], bw[:, 4 + H:4 + 2 * H]], axis=-1)  # (B,2H)

        zr = jax.nn.sigmoid(
            jnp.dot(hh, whzr, preferred_element_type=jnp.float32) + gxzr_t)       # (B,4)
        r_exp = jnp.where(fwd_mask,
                          jnp.broadcast_to(zr[:, 1:2], (B, H2)),
                          jnp.broadcast_to(zr[:, 3:4], (B, H2)))
        hc = jnp.tanh(
            jnp.dot(r_exp * hh, whc, preferred_element_type=jnp.float32) + gxc_t)  # (B,2H)
        z_exp = jnp.where(fwd_mask,
                          jnp.broadcast_to(zr[:, 0:1], (B, H2)),
                          jnp.broadcast_to(zr[:, 2:3], (B, H2)))
        hh = (1.0 - z_exp) * hh + z_exp * hc

    th_list.append(hh)                                  # state before step T-1 (no update)

    # ---- Batched output projection + log-softmax, one lane-dense store. ----
    th = jnp.concatenate(th_list, axis=0)               # (T*B, 2H), register resident
    a = (jnp.dot(th, wo_ref[...], preferred_element_type=jnp.float32)
         + bo_ref[...])                                 # (T*B, Vp); padded cols ~ -1e30
    m = jnp.max(a, axis=-1, keepdims=True)
    lse = m + jnp.log(jnp.sum(jnp.exp(a - m), axis=-1, keepdims=True))
    out_ref[...] = a - lse


def _pack_params(p):
    """Fold/pack the module parameters for the fused kernel."""
    emb = p["embeddings"]
    V, E = emb.shape
    H = p["wh1"].shape[1]

    def split(w):                      # (H+E, out) -> h-part, x-part (torch.cat((h, step), 1))
        return w[:H], w[H:]

    wz1_h, wz1_x = split(p["wz1"])
    wr1_h, wr1_x = split(p["wr1"])
    wh1_h, wh1_x = split(p["wh1"])
    wz2_h, wz2_x = split(p["wz2"])
    wr2_h, wr2_x = split(p["wr2"])
    wh2_h, wh2_x = split(p["wh2"])

    # Pre-folded per-token x-path table (biases folded):  (V, 2*(2+H))
    wx = jnp.concatenate([wz1_x, wr1_x, wh1_x, wz2_x, wr2_x, wh2_x], axis=1)   # (E, 2*(2+H))
    bx = jnp.concatenate([p["bz1"], p["br1"], p["bh1"],
                          p["bz2"], p["br2"], p["bh2"]], axis=1)               # (1, 2*(2+H))
    gxtab = emb @ wx + bx

    # Block-diagonal h-path weights (both directions fused).
    z2 = jnp.zeros((H, 2), jnp.float32)
    zH = jnp.zeros((H, H), jnp.float32)
    whzr_blk = jnp.concatenate(
        [jnp.concatenate([wz1_h, wr1_h, z2], axis=1),
         jnp.concatenate([z2, wz2_h, wr2_h], axis=1)], axis=0)                 # (2H, 4)
    whc_blk = jnp.concatenate(
        [jnp.concatenate([wh1_h, zH], axis=1),
         jnp.concatenate([zH, wh2_h], axis=1)], axis=0)                        # (2H, 2H)

    # Lane-dense (multiple-of-128) output projection; padded logits get -1e30 bias
    # so they vanish from the log-softmax.
    Vp = ((V + 127) // 128) * 128
    wo_pad = jnp.zeros((2 * H, Vp), jnp.float32).at[:, :V].set(p["wo"])
    bo_pad = jnp.full((1, Vp), -1e30, jnp.float32).at[:, :V].set(p["bo"])
    return gxtab, whzr_blk, whc_blk, wo_pad, bo_pad


@jax.jit
def bigru_forward(x, params):
    """x: (T, B) int32 token ids.  Returns (T, B, vocab) log-probs."""
    T, B = x.shape
    V = params["embeddings"].shape[0]
    gxtab, whzr, whc, wo_pad, bo_pad = _pack_params(params)
    Vp = wo_pad.shape[1]

    x_flat = x.reshape(T * B, 1).astype(jnp.int32)
    vmem = pl.BlockSpec(memory_space=pltpu.MemorySpace.VMEM)

    out_flat = pl.pallas_call(
        functools.partial(_bigru_kernel, T=T, B=B),
        out_shape=jax.ShapeDtypeStruct((T * B, Vp), jnp.float32),
        in_specs=[vmem] * 6,
        out_specs=vmem,
    )(x_flat, gxtab, whzr, whc, wo_pad, bo_pad)

    return out_flat[:, :V].reshape(T, B, V)


def init_params(key, vocab_size, hidden_size=8, embedding_size=32):
    H, E, V = hidden_size, embedding_size, vocab_size
    keys = iter(jax.random.split(key, 24))
    bound = 1.0 / np.sqrt(E + H)          # PyTorch nn.Linear default uniform bound
    bound_o = 1.0 / np.sqrt(2 * H)

    def u(shape, b):
        return jax.random.uniform(next(keys), shape, jnp.float32, -b, b)

    p = {"embeddings": jax.random.normal(next(keys), (V, E), jnp.float32)}
    for d in ("1", "2"):
        # (H+E, out) layout: rows [0:H] act on h, rows [H:] on the embedding step.
        p[f"wz{d}"] = u((H + E, 1), bound)
        p[f"bz{d}"] = u((1, 1), bound)
        p[f"wr{d}"] = u((H + E, 1), bound)
        p[f"br{d}"] = u((1, 1), bound)
        p[f"wh{d}"] = u((H + E, H), bound)
        p[f"bh{d}"] = u((1, H), bound)
    p["wo"] = u((2 * H, V), bound_o)      # [wo1; wo2] fused (2H, V)
    p["bo"] = u((1, V), bound_o)
    return p


def bigru_reference(x, p):
    """Pure-JAX reference mirroring the PyTorch forward exactly."""
    enc = p["embeddings"][x]
    T, B, _ = enc.shape
    H = p["wh1"].shape[1]

    def cell(h, step, d):
        hx = jnp.concatenate([h, step], axis=1)
        z = jax.nn.sigmoid(hx @ p[f"wz{d}"] + p[f"bz{d}"])     # (B,1), expand_as over H
        r = jax.nn.sigmoid(hx @ p[f"wr{d}"] + p[f"br{d}"])
        hc = jnp.tanh(jnp.concatenate([r * h, step], axis=1) @ p[f"wh{d}"] + p[f"bh{d}"])
        return (1.0 - z) * h + z * hc

    h = jnp.zeros((B, H), jnp.float32)
    tot1 = []
    for t in range(T):
        tot1.append(h)
        if t == T - 1:
            break
        h = cell(h, enc[t], "1")

    h = jnp.zeros((B, H), jnp.float32)
    tot2 = []
    for t in range(T):
        tot2.append(h)            # indexed by t (not flipped), matching the PyTorch code
        if t == T - 1:
            break
        h = cell(h, enc[T - 1 - t], "2")

    total_h = jnp.concatenate([jnp.stack(tot1), jnp.stack(tot2)], axis=2)   # (T, B, 2H)
    a = total_h @ p["wo"] + p["bo"]
    m = jnp.max(a, axis=2, keepdims=True)
    lse = m + jnp.log(jnp.sum(jnp.exp(a - m), axis=2, keepdims=True))
    return a - lse


if __name__ == "__main__":
    V, H, E = 64, 8, 32          # vocab_size, hidden_size, embedding_size
    T, B = 8, 4                  # seq_length, batch_size

    key = jax.random.PRNGKey(0)
    kp, kx = jax.random.split(key)
    params = init_params(kp, V, H, E)
    x = jax.random.randint(kx, (T, B), 0, V, dtype=jnp.int32)

    out = jax.block_until_ready(bigru_forward(x, params))
    ref = jax.block_until_ready(bigru_reference(x, params))

    assert out.shape == (T, B, V) and out.dtype == jnp.float32
    np.testing.assert_allclose(np.asarray(out), np.asarray(ref), atol=3e-2, rtol=3e-2)
    print("KERNEL_OK")
</pallas_src>

<mosaic_0001>
module attributes {stable_mosaic.version = 11 : i64} {
  func.func @_bigru_kernel(%arg0: memref<32x1xi32, #tpu.memory_space<vmem>>, %arg1: memref<64x20xf32, #tpu.memory_space<vmem>>, %arg2: memref<16x4xf32, #tpu.memory_space<vmem>>, %arg3: memref<16x16xf32, #tpu.memory_space<vmem>>, %arg4: memref<16x128xf32, #tpu.memory_space<vmem>>, %arg5: memref<1x128xf32, #tpu.memory_space<vmem>>, %arg6: memref<32x128xf32, #tpu.memory_space<vmem>>) attributes {dimension_semantics = [], scalar_prefetch = 0 : i64, scratch_operands = 0 : i64, tpu.core_type = #tpu.core_type<tc>} {
    %c0 = arith.constant 0 : index
    %c0_0 = arith.constant 0 : index
    %0 = vector.load %arg0[%c0, %c0_0] : memref<32x1xi32, #tpu.memory_space<vmem>>, vector<32x1xi32>
    %1 = tpu.iota {dimensions = array<i32: 1>} : vector<32x64xi32>
    %2 = vector.broadcast %0 : vector<32x1xi32> to vector<32x64xi32>
    %3 = arith.cmpi eq, %2, %1 : vector<32x64xi32>
    %4 = arith.extui %3 : vector<32x64xi1> to vector<32x64xi32>
    %5 = arith.sitofp %4 : vector<32x64xi32> to vector<32x64xf32>
    %c0_1 = arith.constant 0 : index
    %c0_2 = arith.constant 0 : index
    %6 = vector.load %arg1[%c0_1, %c0_2] : memref<64x20xf32, #tpu.memory_space<vmem>>, vector<64x20xf32>
    %cst = arith.constant dense<0.000000e+00> : vector<32x20xf32>
    %7 = tpu.matmul %5, %6, %cst {dimension_numbers = #tpu.dot_dimension_numbers<[1], [0], [0], [1], [0, 0, 1, 1], [], []>} : vector<32x64xf32>, vector<64x20xf32>, vector<32x20xf32> -> vector<32x20xf32>
    %c0_3 = arith.constant 0 : index
    %c0_4 = arith.constant 0 : index
    %8 = vector.load %arg2[%c0_3, %c0_4] : memref<16x4xf32, #tpu.memory_space<vmem>>, vector<16x4xf32>
    %c0_5 = arith.constant 0 : index
    %c0_6 = arith.constant 0 : index
    %9 = vector.load %arg3[%c0_5, %c0_6] : memref<16x16xf32, #tpu.memory_space<vmem>>, vector<16x16xf32>
    %10 = tpu.iota {dimensions = array<i32: 1>} : vector<4x16xi32>
    %c8_i32 = arith.constant 8 : i32
    %11 = vector.broadcast %c8_i32 : i32 to vector<4x16xi32>
    %12 = arith.cmpi slt, %10, %11 : vector<4x16xi32>
    %cst_7 = arith.constant 0.000000e+00 : f32
    %13 = vector.broadcast %cst_7 : f32 to vector<4x16xf32>
    %14 = vector.extract_strided_slice %7 {offsets = [0, 0], sizes = [4, 20], strides = [1, 1]} : vector<32x20xf32> to vector<4x20xf32>
    %15 = vector.extract_strided_slice %7 {offsets = [28, 0], sizes = [4, 20], strides = [1, 1]} : vector<32x20xf32> to vector<4x20xf32>
    %16 = vector.extract_strided_slice %14 {offsets = [0, 0], sizes = [4, 2], strides = [1, 1]} : vector<4x20xf32> to vector<4x2xf32>
    %17 = vector.extract_strided_slice %15 {offsets = [0, 10], sizes = [4, 2], strides = [1, 1]} : vector<4x20xf32> to vector<4x2xf32>
    %18 = tpu.concatenate %16, %17 in 1 : vector<4x2xf32>, vector<4x2xf32> -> vector<4x4xf32>
    %19 = vector.extract_strided_slice %14 {offsets = [0, 2], sizes = [4, 8], strides = [1, 1]} : vector<4x20xf32> to vector<4x8xf32>
    %20 = vector.extract_strided_slice %15 {offsets = [0, 12], sizes = [4, 8], strides = [1, 1]} : vector<4x20xf32> to vector<4x8xf32>
    %21 = tpu.concatenate %19, %20 in 1 : vector<4x8xf32>, vector<4x8xf32> -> vector<4x16xf32>
    %cst_8 = arith.constant dense<0.000000e+00> : vector<4x4xf32>
    %22 = tpu.matmul %13, %8, %cst_8 {dimension_numbers = #tpu.dot_dimension_numbers<[1], [0], [0], [1], [0, 0, 1, 1], [], []>} : vector<4x16xf32>, vector<16x4xf32>, vector<4x4xf32> -> vector<4x4xf32>
    %23 = arith.addf %22, %18 : vector<4x4xf32>
    %24 = arith.negf %23 : vector<4x4xf32>
    %25 = math.exp %24 : vector<4x4xf32>
    %cst_9 = arith.constant 1.000000e+00 : f32
    %26 = vector.broadcast %cst_9 : f32 to vector<4x4xf32>
    %27 = arith.addf %26, %25 : vector<4x4xf32>
    %28 = arith.divf %26, %27 : vector<4x4xf32>
    %29 = vector.extract_strided_slice %28 {offsets = [0, 1], sizes = [4, 1], strides = [1, 1]} : vector<4x4xf32> to vector<4x1xf32>
    %30 = vector.shape_cast %29 : vector<4x1xf32> to vector<4x1xf32>
    %31 = vector.broadcast %30 : vector<4x1xf32> to vector<4x16xf32>
    %32 = vector.extract_strided_slice %28 {offsets = [0, 3], sizes = [4, 1], strides = [1, 1]} : vector<4x4xf32> to vector<4x1xf32>
    %33 = vector.shape_cast %32 : vector<4x1xf32> to vector<4x1xf32>
    %34 = vector.broadcast %33 : vector<4x1xf32> to vector<4x16xf32>
    %35 = arith.select %12, %31, %34 : vector<4x16xi1>, vector<4x16xf32>
    %36 = arith.mulf %35, %13 : vector<4x16xf32>
    %cst_10 = arith.constant dense<0.000000e+00> : vector<4x16xf32>
    %37 = tpu.matmul %36, %9, %cst_10 {dimension_numbers = #tpu.dot_dimension_numbers<[1], [0], [0], [1], [0, 0, 1, 1], [], []>} : vector<4x16xf32>, vector<16x16xf32>, vector<4x16xf32> -> vector<4x16xf32>
    %38 = arith.addf %37, %21 : vector<4x16xf32>
    %39 = math.tanh %38 : vector<4x16xf32>
    %40 = vector.extract_strided_slice %28 {offsets = [0, 0], sizes = [4, 1], strides = [1, 1]} : vector<4x4xf32> to vector<4x1xf32>
    %41 = vector.shape_cast %40 : vector<4x1xf32> to vector<4x1xf32>
    %42 = vector.broadcast %41 : vector<4x1xf32> to vector<4x16xf32>
    %43 = vector.extract_strided_slice %28 {offsets = [0, 2], sizes = [4, 1], strides = [1, 1]} : vector<4x4xf32> to vector<4x1xf32>
    %44 = vector.shape_cast %43 : vector<4x1xf32> to vector<4x1xf32>
    %45 = vector.broadcast %44 : vector<4x1xf32> to vector<4x16xf32>
    %46 = arith.select %12, %42, %45 : vector<4x16xi1>, vector<4x16xf32>
    %cst_11 = arith.constant 1.000000e+00 : f32
    %47 = vector.broadcast %cst_11 : f32 to vector<4x16xf32>
    %48 = arith.subf %47, %46 : vector<4x16xf32>
    %49 = arith.mulf %48, %13 : vector<4x16xf32>
    %50 = arith.mulf %46, %39 : vector<4x16xf32>
    %51 = arith.addf %49, %50 : vector<4x16xf32>
    %52 = vector.extract_strided_slice %7 {offsets = [4, 0], sizes = [4, 20], strides = [1, 1]} : vector<32x20xf32> to vector<4x20xf32>
    %53 = vector.extract_strided_slice %7 {offsets = [24, 0], sizes = [4, 20], strides = [1, 1]} : vector<32x20xf32> to vector<4x20xf32>
    %54 = vector.extract_strided_slice %52 {offsets = [0, 0], sizes = [4, 2], strides = [1, 1]} : vector<4x20xf32> to vector<4x2xf32>
    %55 = vector.extract_strided_slice %53 {offsets = [0, 10], sizes = [4, 2], strides = [1, 1]} : vector<4x20xf32> to vector<4x2xf32>
    %56 = tpu.concatenate %54, %55 in 1 : vector<4x2xf32>, vector<4x2xf32> -> vector<4x4xf32>
    %57 = vector.extract_strided_slice %52 {offsets = [0, 2], sizes = [4, 8], strides = [1, 1]} : vector<4x20xf32> to vector<4x8xf32>
    %58 = vector.extract_strided_slice %53 {offsets = [0, 12], sizes = [4, 8], strides = [1, 1]} : vector<4x20xf32> to vector<4x8xf32>
    %59 = tpu.concatenate %57, %58 in 1 : vector<4x8xf32>, vector<4x8xf32> -> vector<4x16xf32>
    %cst_12 = arith.constant dense<0.000000e+00> : vector<4x4xf32>
    %60 = tpu.matmul %51, %8, %cst_12 {dimension_numbers = #tpu.dot_dimension_numbers<[1], [0], [0], [1], [0, 0, 1, 1], [], []>} : vector<4x16xf32>, vector<16x4xf32>, vector<4x4xf32> -> vector<4x4xf32>
    %61 = arith.addf %60, %56 : vector<4x4xf32>
    %62 = arith.negf %61 : vector<4x4xf32>
    %63 = math.exp %62 : vector<4x4xf32>
    %cst_13 = arith.constant 1.000000e+00 : f32
    %64 = vector.broadcast %cst_13 : f32 to vector<4x4xf32>
    %65 = arith.addf %64, %63 : vector<4x4xf32>
    %66 = arith.divf %64, %65 : vector<4x4xf32>
    %67 = vector.extract_strided_slice %66 {offsets = [0, 1], sizes = [4, 1], strides = [1, 1]} : vector<4x4xf32> to vector<4x1xf32>
    %68 = vector.shape_cast %67 : vector<4x1xf32> to vector<4x1xf32>
    %69 = vector.broadcast %68 : vector<4x1xf32> to vector<4x16xf32>
    %70 = vector.extract_strided_slice %66 {offsets = [0, 3], sizes = [4, 1], strides = [1, 1]} : vector<4x4xf32> to vector<4x1xf32>
    %71 = vector.shape_cast %70 : vector<4x1xf32> to vector<4x1xf32>
    %72 = vector.broadcast %71 : vector<4x1xf32> to vector<4x16xf32>
    %73 = arith.select %12, %69, %72 : vector<4x16xi1>, vector<4x16xf32>
    %74 = arith.mulf %73, %51 : vector<4x16xf32>
    %cst_14 = arith.constant dense<0.000000e+00> : vector<4x16xf32>
    %75 = tpu.matmul %74, %9, %cst_14 {dimension_numbers = #tpu.dot_dimension_numbers<[1], [0], [0], [1], [0, 0, 1, 1], [], []>} : vector<4x16xf32>, vector<16x16xf32>, vector<4x16xf32> -> vector<4x16xf32>
    %76 = arith.addf %75, %59 : vector<4x16xf32>
    %77 = math.tanh %76 : vector<4x16xf32>
    %78 = vector.extract_strided_slice %66 {offsets = [0, 0], sizes = [4, 1], strides = [1, 1]} : vector<4x4xf32> to vector<4x1xf32>
    %79 = vector.shape_cast %78 : vector<4x1xf32> to vector<4x1xf32>
    %80 = vector.broadcast %79 : vector<4x1xf32> to vector<4x16xf32>
    %81 = vector.extract_strided_slice %66 {offsets = [0, 2], sizes = [4, 1], strides = [1, 1]} : vector<4x4xf32> to vector<4x1xf32>
    %82 = vector.shape_cast %81 : vector<4x1xf32> to vector<4x1xf32>
    %83 = vector.broadcast %82 : vector<4x1xf32> to vector<4x16xf32>
    %84 = arith.select %12, %80, %83 : vector<4x16xi1>, vector<4x16xf32>
    %cst_15 = arith.constant 1.000000e+00 : f32
    %85 = vector.broadcast %cst_15 : f32 to vector<4x16xf32>
    %86 = arith.subf %85, %84 : vector<4x16xf32>
    %87 = arith.mulf %86, %51 : vector<4x16xf32>
    %88 = arith.mulf %84, %77 : vector<4x16xf32>
    %89 = arith.addf %87, %88 : vector<4x16xf32>
    %90 = vector.extract_strided_slice %7 {offsets = [8, 0], sizes = [4, 20], strides = [1, 1]} : vector<32x20xf32> to vector<4x20xf32>
    %91 = vector.extract_strided_slice %7 {offsets = [20, 0], sizes = [4, 20], strides = [1, 1]} : vector<32x20xf32> to vector<4x20xf32>
    %92 = vector.extract_strided_slice %90 {offsets = [0, 0], sizes = [4, 2], strides = [1, 1]} : vector<4x20xf32> to vector<4x2xf32>
    %93 = vector.extract_strided_slice %91 {offsets = [0, 10], sizes = [4, 2], strides = [1, 1]} : vector<4x20xf32> to vector<4x2xf32>
    %94 = tpu.concatenate %92, %93 in 1 : vector<4x2xf32>, vector<4x2xf32> -> vector<4x4xf32>
    %95 = vector.extract_strided_slice %90 {offsets = [0, 2], sizes = [4, 8], strides = [1, 1]} : vector<4x20xf32> to vector<4x8xf32>
    %96 = vector.extract_strided_slice %91 {offsets = [0, 12], sizes = [4, 8], strides = [1, 1]} : vector<4x20xf32> to vector<4x8xf32>
    %97 = tpu.concatenate %95, %96 in 1 : vector<4x8xf32>, vector<4x8xf32> -> vector<4x16xf32>
    %cst_16 = arith.constant dense<0.000000e+00> : vector<4x4xf32>
    %98 = tpu.matmul %89, %8, %cst_16 {dimension_numbers = #tpu.dot_dimension_numbers<[1], [0], [0], [1], [0, 0, 1, 1], [], []>} : vector<4x16xf32>, vector<16x4xf32>, vector<4x4xf32> -> vector<4x4xf32>
    %99 = arith.addf %98, %94 : vector<4x4xf32>
    %100 = arith.negf %99 : vector<4x4xf32>
    %101 = math.exp %100 : vector<4x4xf32>
    %cst_17 = arith.constant 1.000000e+00 : f32
    %102 = vector.broadcast %cst_17 : f32 to vector<4x4xf32>
    %103 = arith.addf %102, %101 : vector<4x4xf32>
    %104 = arith.divf %102, %103 : vector<4x4xf32>
    %105 = vector.extract_strided_slice %104 {offsets = [0, 1], sizes = [4, 1], strides = [1, 1]} : vector<4x4xf32> to vector<4x1xf32>
    %106 = vector.shape_cast %105 : vector<4x1xf32> to vector<4x1xf32>
    %107 = vector.broadcast %106 : vector<4x1xf32> to vector<4x16xf32>
    %108 = vector.extract_strided_slice %104 {offsets = [0, 3], sizes = [4, 1], strides = [1, 1]} : vector<4x4xf32> to vector<4x1xf32>
    %109 = vector.shape_cast %108 : vector<4x1xf32> to vector<4x1xf32>
    %110 = vector.broadcast %109 : vector<4x1xf32> to vector<4x16xf32>
    %111 = arith.select %12, %107, %110 : vector<4x16xi1>, vector<4x16xf32>
    %112 = arith.mulf %111, %89 : vector<4x16xf32>
    %cst_18 = arith.constant dense<0.000000e+00> : vector<4x16xf32>
    %113 = tpu.matmul %112, %9, %cst_18 {dimension_numbers = #tpu.dot_dimension_numbers<[1], [0], [0], [1], [0, 0, 1, 1], [], []>} : vector<4x16xf32>, vector<16x16xf32>, vector<4x16xf32> -> vector<4x16xf32>
    %114 = arith.addf %113, %97 : vector<4x16xf32>
    %115 = math.tanh %114 : vector<4x16xf32>
    %116 = vector.extract_strided_slice %104 {offsets = [0, 0], sizes = [4, 1], strides = [1, 1]} : vector<4x4xf32> to vector<4x1xf32>
    %117 = vector.shape_cast %116 : vector<4x1xf32> to vector<4x1xf32>
    %118 = vector.broadcast %117 : vector<4x1xf32> to vector<4x16xf32>
    %119 = vector.extract_strided_slice %104 {offsets = [0, 2], sizes = [4, 1], strides = [1, 1]} : vector<4x4xf32> to vector<4x1xf32>
    %120 = vector.shape_cast %119 : vector<4x1xf32> to vector<4x1xf32>
    %121 = vector.broadcast %120 : vector<4x1xf32> to vector<4x16xf32>
    %122 = arith.select %12, %118, %121 : vector<4x16xi1>, vector<4x16xf32>
    %cst_19 = arith.constant 1.000000e+00 : f32
    %123 = vector.broadcast %cst_19 : f32 to vector<4x16xf32>
    %124 = arith.subf %123, %122 : vector<4x16xf32>
    %125 = arith.mulf %124, %89 : vector<4x16xf32>
    %126 = arith.mulf %122, %115 : vector<4x16xf32>
    %127 = arith.addf %125, %126 : vector<4x16xf32>
    %128 = vector.extract_strided_slice %7 {offsets = [12, 0], sizes = [4, 20], strides = [1, 1]} : vector<32x20xf32> to vector<4x20xf32>
    %129 = vector.extract_strided_slice %7 {offsets = [16, 0], sizes = [4, 20], strides = [1, 1]} : vector<32x20xf32> to vector<4x20xf32>
    %130 = vector.extract_strided_slice %128 {offsets = [0, 0], sizes = [4, 2], strides = [1, 1]} : vector<4x20xf32> to vector<4x2xf32>
    %131 = vector.extract_strided_slice %129 {offsets = [0, 10], sizes = [4, 2], strides = [1, 1]} : vector<4x20xf32> to vector<4x2xf32>
    %132 = tpu.concatenate %130, %131 in 1 : vector<4x2xf32>, vector<4x2xf32> -> vector<4x4xf32>
    %133 = vector.extract_strided_slice %128 {offsets = [0, 2], sizes = [4, 8], strides = [1, 1]} : vector<4x20xf32> to vector<4x8xf32>
    %134 = vector.extract_strided_slice %129 {offsets = [0, 12], sizes = [4, 8], strides = [1, 1]} : vector<4x20xf32> to vector<4x8xf32>
    %135 = tpu.concatenate %133, %134 in 1 : vector<4x8xf32>, vector<4x8xf32> -> vector<4x16xf32>
    %cst_20 = arith.constant dense<0.000000e+00> : vector<4x4xf32>
    %136 = tpu.matmul %127, %8, %cst_20 {dimension_numbers = #tpu.dot_dimension_numbers<[1], [0], [0], [1], [0, 0, 1, 1], [], []>} : vector<4x16xf32>, vector<16x4xf32>, vector<4x4xf32> -> vector<4x4xf32>
    %137 = arith.addf %136, %132 : vector<4x4xf32>
    %138 = arith.negf %137 : vector<4x4xf32>
    %139 = math.exp %138 : vector<4x4xf32>
    %cst_21 = arith.constant 1.000000e+00 : f32
    %140 = vector.broadcast %cst_21 : f32 to vector<4x4xf32>
    %141 = arith.addf %140, %139 : vector<4x4xf32>
    %142 = arith.divf %140, %141 : vector<4x4xf32>
    %143 = vector.extract_strided_slice %142 {offsets = [0, 1], sizes = [4, 1], strides = [1, 1]} : vector<4x4xf32> to vector<4x1xf32>
    %144 = vector.shape_cast %143 : vector<4x1xf32> to vector<4x1xf32>
    %145 = vector.broadcast %144 : vector<4x1xf32> to vector<4x16xf32>
    %146 = vector.extract_strided_slice %142 {offsets = [0, 3], sizes = [4, 1], strides = [1, 1]} : vector<4x4xf32> to vector<4x1xf32>
    %147 = vector.shape_cast %146 : vector<4x1xf32> to vector<4x1xf32>
    %148 = vector.broadcast %147 : vector<4x1xf32> to vector<4x16xf32>
    %149 = arith.select %12, %145, %148 : vector<4x16xi1>, vector<4x16xf32>
    %150 = arith.mulf %149, %127 : vector<4x16xf32>
    %cst_22 = arith.constant dense<0.000000e+00> : vector<4x16xf32>
    %151 = tpu.matmul %150, %9, %cst_22 {dimension_numbers = #tpu.dot_dimension_numbers<[1], [0], [0], [1], [0, 0, 1, 1], [], []>} : vector<4x16xf32>, vector<16x16xf32>, vector<4x16xf32> -> vector<4x16xf32>
    %152 = arith.addf %151, %135 : vector<4x16xf32>
    %153 = math.tanh %152 : vector<4x16xf32>
    %154 = vector.extract_strided_slice %142 {offsets = [0, 0], sizes = [4, 1], strides = [1, 1]} : vector<4x4xf32> to vector<4x1xf32>
    %155 = vector.shape_cast %154 : vector<4x1xf32> to vector<4x1xf32>
    %156 = vector.broadcast %155 : vector<4x1xf32> to vector<4x16xf32>
    %157 = vector.extract_strided_slice %142 {offsets = [0, 2], sizes = [4, 1], strides = [1, 1]} : vector<4x4xf32> to vector<4x1xf32>
    %158 = vector.shape_cast %157 : vector<4x1xf32> to vector<4x1xf32>
    %159 = vector.broadcast %158 : vector<4x1xf32> to vector<4x16xf32>
    %160 = arith.select %12, %156, %159 : vector<4x16xi1>, vector<4x16xf32>
    %cst_23 = arith.constant 1.000000e+00 : f32
    %161 = vector.broadcast %cst_23 : f32 to vector<4x16xf32>
    %162 = arith.subf %161, %160 : vector<4x16xf32>
    %163 = arith.mulf %162, %127 : vector<4x16xf32>
    %164 = arith.mulf %160, %153 : vector<4x16xf32>
    %165 = arith.addf %163, %164 : vector<4x16xf32>
    %166 = vector.extract_strided_slice %7 {offsets = [16, 0], sizes = [4, 20], strides = [1, 1]} : vector<32x20xf32> to vector<4x20xf32>
    %167 = vector.extract_strided_slice %7 {offsets = [12, 0], sizes = [4, 20], strides = [1, 1]} : vector<32x20xf32> to vector<4x20xf32>
    %168 = vector.extract_strided_slice %166 {offsets = [0, 0], sizes = [4, 2], strides = [1, 1]} : vector<4x20xf32> to vector<4x2xf32>
    %169 = vector.extract_strided_slice %167 {offsets = [0, 10], sizes = [4, 2], strides = [1, 1]} : vector<4x20xf32> to vector<4x2xf32>
    %170 = tpu.concatenate %168, %169 in 1 : vector<4x2xf32>, vector<4x2xf32> -> vector<4x4xf32>
    %171 = vector.extract_strided_slice %166 {offsets = [0, 2], sizes = [4, 8], strides = [1, 1]} : vector<4x20xf32> to vector<4x8xf32>
    %172 = vector.extract_strided_slice %167 {offsets = [0, 12], sizes = [4, 8], strides = [1, 1]} : vector<4x20xf32> to vector<4x8xf32>
    %173 = tpu.concatenate %171, %172 in 1 : vector<4x8xf32>, vector<4x8xf32> -> vector<4x16xf32>
    %cst_24 = arith.constant dense<0.000000e+00> : vector<4x4xf32>
    %174 = tpu.matmul %165, %8, %cst_24 {dimension_numbers = #tpu.dot_dimension_numbers<[1], [0], [0], [1], [0, 0, 1, 1], [], []>} : vector<4x16xf32>, vector<16x4xf32>, vector<4x4xf32> -> vector<4x4xf32>
    %175 = arith.addf %174, %170 : vector<4x4xf32>
    %176 = arith.negf %175 : vector<4x4xf32>
    %177 = math.exp %176 : vector<4x4xf32>
    %cst_25 = arith.constant 1.000000e+00 : f32
    %178 = vector.broadcast %cst_25 : f32 to vector<4x4xf32>
    %179 = arith.addf %178, %177 : vector<4x4xf32>
    %180 = arith.divf %178, %179 : vector<4x4xf32>
    %181 = vector.extract_strided_slice %180 {offsets = [0, 1], sizes = [4, 1], strides = [1, 1]} : vector<4x4xf32> to vector<4x1xf32>
    %182 = vector.shape_cast %181 : vector<4x1xf32> to vector<4x1xf32>
    %183 = vector.broadcast %182 : vector<4x1xf32> to vector<4x16xf32>
    %184 = vector.extract_strided_slice %180 {offsets = [0, 3], sizes = [4, 1], strides = [1, 1]} : vector<4x4xf32> to vector<4x1xf32>
    %185 = vector.shape_cast %184 : vector<4x1xf32> to vector<4x1xf32>
    %186 = vector.broadcast %185 : vector<4x1xf32> to vector<4x16xf32>
    %187 = arith.select %12, %183, %186 : vector<4x16xi1>, vector<4x16xf32>
    %188 = arith.mulf %187, %165 : vector<4x16xf32>
    %cst_26 = arith.constant dense<0.000000e+00> : vector<4x16xf32>
    %189 = tpu.matmul %188, %9, %cst_26 {dimension_numbers = #tpu.dot_dimension_numbers<[1], [0], [0], [1], [0, 0, 1, 1], [], []>} : vector<4x16xf32>, vector<16x16xf32>, vector<4x16xf32> -> vector<4x16xf32>
    %190 = arith.addf %189, %173 : vector<4x16xf32>
    %191 = math.tanh %190 : vector<4x16xf32>
    %192 = vector.extract_strided_slice %180 {offsets = [0, 0], sizes = [4, 1], strides = [1, 1]} : vector<4x4xf32> to vector<4x1xf32>
    %193 = vector.shape_cast %192 : vector<4x1xf32> to vector<4x1xf32>
    %194 = vector.broadcast %193 : vector<4x1xf32> to vector<4x16xf32>
    %195 = vector.extract_strided_slice %180 {offsets = [0, 2], sizes = [4, 1], strides = [1, 1]} : vector<4x4xf32> to vector<4x1xf32>
    %196 = vector.shape_cast %195 : vector<4x1xf32> to vector<4x1xf32>
    %197 = vector.broadcast %196 : vector<4x1xf32> to vector<4x16xf32>
    %198 = arith.select %12, %194, %197 : vector<4x16xi1>, vector<4x16xf32>
    %cst_27 = arith.constant 1.000000e+00 : f32
    %199 = vector.broadcast %cst_27 : f32 to vector<4x16xf32>
    %200 = arith.subf %199, %198 : vector<4x16xf32>
    %201 = arith.mulf %200, %165 : vector<4x16xf32>
    %202 = arith.mulf %198, %191 : vector<4x16xf32>
    %203 = arith.addf %201, %202 : vector<4x16xf32>
    %204 = vector.extract_strided_slice %7 {offsets = [20, 0], sizes = [4, 20], strides = [1, 1]} : vector<32x20xf32> to vector<4x20xf32>
    %205 = vector.extract_strided_slice %7 {offsets = [8, 0], sizes = [4, 20], strides = [1, 1]} : vector<32x20xf32> to vector<4x20xf32>
    %206 = vector.extract_strided_slice %204 {offsets = [0, 0], sizes = [4, 2], strides = [1, 1]} : vector<4x20xf32> to vector<4x2xf32>
    %207 = vector.extract_strided_slice %205 {offsets = [0, 10], sizes = [4, 2], strides = [1, 1]} : vector<4x20xf32> to vector<4x2xf32>
    %208 = tpu.concatenate %206, %207 in 1 : vector<4x2xf32>, vector<4x2xf32> -> vector<4x4xf32>
    %209 = vector.extract_strided_slice %204 {offsets = [0, 2], sizes = [4, 8], strides = [1, 1]} : vector<4x20xf32> to vector<4x8xf32>
    %210 = vector.extract_strided_slice %205 {offsets = [0, 12], sizes = [4, 8], strides = [1, 1]} : vector<4x20xf32> to vector<4x8xf32>
    %211 = tpu.concatenate %209, %210 in 1 : vector<4x8xf32>, vector<4x8xf32> -> vector<4x16xf32>
    %cst_28 = arith.constant dense<0.000000e+00> : vector<4x4xf32>
    %212 = tpu.matmul %203, %8, %cst_28 {dimension_numbers = #tpu.dot_dimension_numbers<[1], [0], [0], [1], [0, 0, 1, 1], [], []>} : vector<4x16xf32>, vector<16x4xf32>, vector<4x4xf32> -> vector<4x4xf32>
    %213 = arith.addf %212, %208 : vector<4x4xf32>
    %214 = arith.negf %213 : vector<4x4xf32>
    %215 = math.exp %214 : vector<4x4xf32>
    %cst_29 = arith.constant 1.000000e+00 : f32
    %216 = vector.broadcast %cst_29 : f32 to vector<4x4xf32>
    %217 = arith.addf %216, %215 : vector<4x4xf32>
    %218 = arith.divf %216, %217 : vector<4x4xf32>
    %219 = vector.extract_strided_slice %218 {offsets = [0, 1], sizes = [4, 1], strides = [1, 1]} : vector<4x4xf32> to vector<4x1xf32>
    %220 = vector.shape_cast %219 : vector<4x1xf32> to vector<4x1xf32>
    %221 = vector.broadcast %220 : vector<4x1xf32> to vector<4x16xf32>
    %222 = vector.extract_strided_slice %218 {offsets = [0, 3], sizes = [4, 1], strides = [1, 1]} : vector<4x4xf32> to vector<4x1xf32>
    %223 = vector.shape_cast %222 : vector<4x1xf32> to vector<4x1xf32>
    %224 = vector.broadcast %223 : vector<4x1xf32> to vector<4x16xf32>
    %225 = arith.select %12, %221, %224 : vector<4x16xi1>, vector<4x16xf32>
    %226 = arith.mulf %225, %203 : vector<4x16xf32>
    %cst_30 = arith.constant dense<0.000000e+00> : vector<4x16xf32>
    %227 = tpu.matmul %226, %9, %cst_30 {dimension_numbers = #tpu.dot_dimension_numbers<[1], [0], [0], [1], [0, 0, 1, 1], [], []>} : vector<4x16xf32>, vector<16x16xf32>, vector<4x16xf32> -> vector<4x16xf32>
    %228 = arith.addf %227, %211 : vector<4x16xf32>
    %229 = math.tanh %228 : vector<4x16xf32>
    %230 = vector.extract_strided_slice %218 {offsets = [0, 0], sizes = [4, 1], strides = [1, 1]} : vector<4x4xf32> to vector<4x1xf32>
    %231 = vector.shape_cast %230 : vector<4x1xf32> to vector<4x1xf32>
    %232 = vector.broadcast %231 : vector<4x1xf32> to vector<4x16xf32>
    %233 = vector.extract_strided_slice %218 {offsets = [0, 2], sizes = [4, 1], strides = [1, 1]} : vector<4x4xf32> to vector<4x1xf32>
    %234 = vector.shape_cast %233 : vector<4x1xf32> to vector<4x1xf32>
    %235 = vector.broadcast %234 : vector<4x1xf32> to vector<4x16xf32>
    %236 = arith.select %12, %232, %235 : vector<4x16xi1>, vector<4x16xf32>
    %cst_31 = arith.constant 1.000000e+00 : f32
    %237 = vector.broadcast %cst_31 : f32 to vector<4x16xf32>
    %238 = arith.subf %237, %236 : vector<4x16xf32>
    %239 = arith.mulf %238, %203 : vector<4x16xf32>
    %240 = arith.mulf %236, %229 : vector<4x16xf32>
    %241 = arith.addf %239, %240 : vector<4x16xf32>
    %242 = vector.extract_strided_slice %7 {offsets = [24, 0], sizes = [4, 20], strides = [1, 1]} : vector<32x20xf32> to vector<4x20xf32>
    %243 = vector.extract_strided_slice %7 {offsets = [4, 0], sizes = [4, 20], strides = [1, 1]} : vector<32x20xf32> to vector<4x20xf32>
    %244 = vector.extract_strided_slice %242 {offsets = [0, 0], sizes = [4, 2], strides = [1, 1]} : vector<4x20xf32> to vector<4x2xf32>
    %245 = vector.extract_strided_slice %243 {offsets = [0, 10], sizes = [4, 2], strides = [1, 1]} : vector<4x20xf32> to vector<4x2xf32>
    %246 = tpu.concatenate %244, %245 in 1 : vector<4x2xf32>, vector<4x2xf32> -> vector<4x4xf32>
    %247 = vector.extract_strided_slice %242 {offsets = [0, 2], sizes = [4, 8], strides = [1, 1]} : vector<4x20xf32> to vector<4x8xf32>
    %248 = vector.extract_strided_slice %243 {offsets = [0, 12], sizes = [4, 8], strides = [1, 1]} : vector<4x20xf32> to vector<4x8xf32>
    %249 = tpu.concatenate %247, %248 in 1 : vector<4x8xf32>, vector<4x8xf32> -> vector<4x16xf32>
    %cst_32 = arith.constant dense<0.000000e+00> : vector<4x4xf32>
    %250 = tpu.matmul %241, %8, %cst_32 {dimension_numbers = #tpu.dot_dimension_numbers<[1], [0], [0], [1], [0, 0, 1, 1], [], []>} : vector<4x16xf32>, vector<16x4xf32>, vector<4x4xf32> -> vector<4x4xf32>
    %251 = arith.addf %250, %246 : vector<4x4xf32>
    %252 = arith.negf %251 : vector<4x4xf32>
    %253 = math.exp %252 : vector<4x4xf32>
    %cst_33 = arith.constant 1.000000e+00 : f32
    %254 = vector.broadcast %cst_33 : f32 to vector<4x4xf32>
    %255 = arith.addf %254, %253 : vector<4x4xf32>
    %256 = arith.divf %254, %255 : vector<4x4xf32>
    %257 = vector.extract_strided_slice %256 {offsets = [0, 1], sizes = [4, 1], strides = [1, 1]} : vector<4x4xf32> to vector<4x1xf32>
    %258 = vector.shape_cast %257 : vector<4x1xf32> to vector<4x1xf32>
    %259 = vector.broadcast %258 : vector<4x1xf32> to vector<4x16xf32>
    %260 = vector.extract_strided_slice %256 {offsets = [0, 3], sizes = [4, 1], strides = [1, 1]} : vector<4x4xf32> to vector<4x1xf32>
    %261 = vector.shape_cast %260 : vector<4x1xf32> to vector<4x1xf32>
    %262 = vector.broadcast %261 : vector<4x1xf32> to vector<4x16xf32>
    %263 = arith.select %12, %259, %262 : vector<4x16xi1>, vector<4x16xf32>
    %264 = arith.mulf %263, %241 : vector<4x16xf32>
    %cst_34 = arith.constant dense<0.000000e+00> : vector<4x16xf32>
    %265 = tpu.matmul %264, %9, %cst_34 {dimension_numbers = #tpu.dot_dimension_numbers<[1], [0], [0], [1], [0, 0, 1, 1], [], []>} : vector<4x16xf32>, vector<16x16xf32>, vector<4x16xf32> -> vector<4x16xf32>
    %266 = arith.addf %265, %249 : vector<4x16xf32>
    %267 = math.tanh %266 : vector<4x16xf32>
    %268 = vector.extract_strided_slice %256 {offsets = [0, 0], sizes = [4, 1], strides = [1, 1]} : vector<4x4xf32> to vector<4x1xf32>
    %269 = vector.shape_cast %268 : vector<4x1xf32> to vector<4x1xf32>
    %270 = vector.broadcast %269 : vector<4x1xf32> to vector<4x16xf32>
    %271 = vector.extract_strided_slice %256 {offsets = [0, 2], sizes = [4, 1], strides = [1, 1]} : vector<4x4xf32> to vector<4x1xf32>
    %272 = vector.shape_cast %271 : vector<4x1xf32> to vector<4x1xf32>
    %273 = vector.broadcast %272 : vector<4x1xf32> to vector<4x16xf32>
    %274 = arith.select %12, %270, %273 : vector<4x16xi1>, vector<4x16xf32>
    %cst_35 = arith.constant 1.000000e+00 : f32
    %275 = vector.broadcast %cst_35 : f32 to vector<4x16xf32>
    %276 = arith.subf %275, %274 : vector<4x16xf32>
    %277 = arith.mulf %276, %241 : vector<4x16xf32>
    %278 = arith.mulf %274, %267 : vector<4x16xf32>
    %279 = arith.addf %277, %278 : vector<4x16xf32>
    %280 = tpu.concatenate %13, %51, %89, %127, %165, %203, %241, %279 in 0 : vector<4x16xf32>, vector<4x16xf32>, vector<4x16xf32>, vector<4x16xf32>, vector<4x16xf32>, vector<4x16xf32>, vector<4x16xf32>, vector<4x16xf32> -> vector<32x16xf32>
    %c0_36 = arith.constant 0 : index
    %c0_37 = arith.constant 0 : index
    %281 = vector.load %arg4[%c0_36, %c0_37] : memref<16x128xf32, #tpu.memory_space<vmem>>, vector<16x128xf32>
    %cst_38 = arith.constant dense<0.000000e+00> : vector<32x128xf32>
    %282 = tpu.matmul %280, %281, %cst_38 {dimension_numbers = #tpu.dot_dimension_numbers<[1], [0], [0], [1], [0, 0, 1, 1], [], []>} : vector<32x16xf32>, vector<16x128xf32>, vector<32x128xf32> -> vector<32x128xf32>
    %c0_39 = arith.constant 0 : index
    %c0_40 = arith.constant 0 : index
    %283 = vector.load %arg5[%c0_39, %c0_40] : memref<1x128xf32, #tpu.memory_space<vmem>>, vector<1x128xf32>
    %284 = vector.broadcast %283 : vector<1x128xf32> to vector<32x128xf32>
    %285 = arith.addf %282, %284 : vector<32x128xf32>
    %cst_41 = arith.constant dense<0xFF800000> : vector<32xf32>
    %286 = vector.multi_reduction <maximumf>, %285, %cst_41 [1] : vector<32x128xf32> to vector<32xf32>
    %287 = vector.shape_cast %286 : vector<32xf32> to vector<32x1xf32>
    %288 = vector.broadcast %287 : vector<32x1xf32> to vector<32x128xf32>
    %289 = arith.subf %285, %288 : vector<32x128xf32>
    %290 = math.exp %289 : vector<32x128xf32>
    %cst_42 = arith.constant dense<0.000000e+00> : vector<32xf32>
    %291 = vector.multi_reduction <add>, %290, %cst_42 [1] : vector<32x128xf32> to vector<32xf32>
    %292 = vector.shape_cast %291 : vector<32xf32> to vector<32x1xf32>
    %293 = math.log %292 : vector<32x1xf32>
    %294 = arith.addf %287, %293 : vector<32x1xf32>
    %295 = vector.broadcast %294 : vector<32x1xf32> to vector<32x128xf32>
    %296 = arith.subf %285, %295 : vector<32x128xf32>
    %c0_43 = arith.constant 0 : index
    %c0_44 = arith.constant 0 : index
    %297 = vector.load %arg6[%c0_43, %c0_44] : memref<32x128xf32, #tpu.memory_space<vmem>>, vector<32x128xf32>
    tpu.vector_store %arg6[%c0_43, %c0_44], %296 {strides = array<i32>} : memref<32x128xf32, #tpu.memory_space<vmem>>, vector<32x128xf32>,
    return
  }
}

</mosaic_0001>

<bundles_post_ra>
// kernel: bigru_forward.1
= control target key start
LH: loop header
LB: loop body
LE: loop exit
PB: predicated region body
PF: predicated region fallthrough
CT: control target
= control target key end

     0   :  { %v2005_v2 = vmov 0   ;;  %v2006_v7 = vmov 0.0   ;;  %s2378_s0 = inlined_call_operand.vmem [shape: s32[32,1], index: 0, kind: input, shape index: {}]   ;;  %s2379_s1 = inlined_call_operand.vmem [shape: f32[64,20], index: 1, kind: input, shape index: {}]   ;;  %s2380_s2 = inlined_call_operand.vmem [shape: f32[16,4], index: 2, kind: input, shape index: {}]   ;;  %s2381_s3 = inlined_call_operand.vmem [shape: f32[16,16], index: 3, kind: input, shape index: {}]   ;;  %s2382_s4 = inlined_call_operand.vmem [shape: f32[16,128], index: 4, kind: input, shape index: {}]   ;;  %s2383_s5 = inlined_call_operand.vmem [shape: f32[1,128], index: 5, kind: input, shape index: {}]   ;;  %s2384_s6 = inlined_call_operand.hbm [shape: f32[32,128], index: 6, kind: output, shape index: {}]  }
   0x1   :  { %v26_v0 = vld [vmem:[%s2378_s0 + $0x10] sm:$0xff]  ;;  %v24_v1 = vld [vmem:[%s2378_s0] sm:$0xff]  ;;  %1897 = vset.pattern.permute.xlu1 %v2005_v2  ;;  %1896 = vset.pattern.permute.xlu0 %v2005_v2  ;;  %v61_v3 = vld [vmem:[%s2379_s1 + $0x38] sm:$0xff] }
   0x2   :  { %37 = vperm.xlu1 %1897, %v26_v0   ;;  %31 = vperm.xlu0 %1896, %v24_v1   ;;  %v60_v4 = vld [vmem:[%s2379_s1 + $0x30] sm:$0xff]  ;;  %v27_v5 = vld [vmem:[%s2378_s0 + $0x18] sm:$0xff]  ;;  %v25_v6 = vld [vmem:[%s2378_s0 + $0x8] sm:$0xff] }
   0x3   :  { %1754 = vmatprep.subr.mxu0 %v61_v3  ;;  %1776 = vmatprep.subr.mxu1 %v2006_v7 }
   0x4   :  { %1755 = vmatpush3.msra.mxu0 %v61_v3 }
   0x5   :  { %11 = vsyncpa [#allocation3], 0  ;;  %1756 = vmatprep.subr.mxu0 %v60_v4  ;;  %v59_v8 = vld [vmem:[%s2379_s1 + $0x28] sm:$0xff]  ;;  %v58_v9 = vld [vmem:[%s2379_s1 + $0x20] sm:$0xff]  ;;  %vm2007_vm0 = vmmov 0   ;;  %v28_v16 = vlaneseq  ;;  %vm62_vm1 = vcmask 523264  }
   0x6   :  { %40 = vperm.xlu1 %1897, %v27_v5   ;;  %34 = vperm.xlu0 %1896, %v25_v6   ;;  %v2082_v10 = vld [vmem:[%s2380_s2 + $0x8] sm:$0xff]  ;;  %v2087_v11 = vld [vmem:[%s2380_s2] sm:$0xff]  ;;  %v57_v12 = vld [vmem:[%s2379_s1 + $0x18] sm:$0xff]  ;;  %v2009_v32 = vmov 1   ;;  %v2010_v33 = vmov 3   ;;  %vm170_vm6 = vcmask 15360  }
   0x7   :  { %1757 = vmatpush3.msra.mxu0 %v60_v4  ;;  %1777 = vmatpush3.msra.mxu1 %v2082_v10  ;;  %v56_v13 = vld [vmem:[%s2379_s1 + $0x10] sm:$0xff]  ;;  %v55_v14 = vld [vmem:[%s2379_s1 + $0x8] sm:$0xff]  ;;  %v54_v15 = vld [vmem:[%s2379_s1] sm:$0xff]  ;;  %v2111_v17 = vand.u32 127, %v28_v16  ;;  %s2008_s1 = smov 120   ;;  %s2011_s27 = smov 126  }
   0x8   :  { %1758 = vmatprep.subr.mxu0 %v59_v8  ;;  %1778 = vmatprep.subr.mxu1 %v2006_v7  ;;  %v2136_v34 = vld [vmem:[%s2381_s3 + $0x8] sm:$0xff]  ;;  %v2150_v41 = vld [vmem:[%s2381_s3] sm:$0xff]  ;;  %v2012_v43 = vmov 2   ;;  %s2013_s3 = smov 124   ;;  %vm181_vm8 = vcmask 130048   ;;  %vm179_vm9 = vcmask 64512  }
   0x9   :  { %1759 = vmatpush3.msra.mxu0 %v59_v8  ;;  %1779 = vmatpush3.msra.mxu1 %v2087_v11  ;;  %vm164_vm7 = vcmp.lt.s32.totalorder %v2111_v17, 8  ;;  %vm1486_vm10 = vcmask 1043456  }
   0xa   :  { %1760 = vmatprep.subr.mxu0 %v58_v9  ;;  %1780 = vmatprep.mubr.msk.f32.mxu1 %vm2007_vm0, %v2006_v7 }
   0xb   :  { %1761 = vmatpush3.msra.mxu0 %v58_v9  ;;  %1781 = vmatmul.mubr.f32.vlgmr.msra.gmra.mxu1 %v2006_v7 }
   0xc   :  { %1762 = vmatprep.subr.mxu0 %v57_v12  ;;  %1783 = vmatprep.subr.mxu1 %v2006_v7 }
   0xd   :  { %1763 = vmatpush3.msra.mxu0 %v57_v12  ;;  %1787 = vmatprep.mubr.msk.f32.mxu1 %vm2007_vm0, %v2006_v7 }
   0xe   :  { %1764 = vmatprep.subr.mxu0 %v56_v13  ;;  %1898 = vset.pattern.permute.xlu1 %v2009_v32 }
   0xf   :  { %1765 = vmatpush3.msra.mxu0 %v56_v13  ;;  %1899 = vset.pattern.permute.xlu0 %v2010_v33 }
  0x10   :  { %1766 = vmatprep.subr.mxu0 %v55_v14  ;;  %1784 = vmatpush3.msra.mxu1 %v2136_v34 }
  0x11   :  { %1767 = vmatpush3.msra.mxu0 %v55_v14  ;;  %1785 = vmatprep.subr.mxu1 %v2006_v7 }
  0x12   :  { %1768 = vmatprep.subr.mxu0 %v54_v15  ;;  %1786 = vmatpush3.msra.mxu1 %v2150_v41 }
  0x13   :  { %1769 = vmatpush3.msra.mxu0 %v54_v15  ;;  %1790 = vmatprep.subr.mxu1 %v2006_v7 }
  0x14   :  { %1811 = vmatprep.subr.mxu0 %v2006_v7 }
  0x7d   :  { %v38_v18 = vpop.permute.xlu1 %37  ;;  %v32_v19 = vpop.permute.xlu0 %31 }
  0x7e   :  { %vm42_vm2 = vcmp.eq.s32.totalorder %v32_v19, %v2111_v17  ;;  %vm44_vm3 = vcmp.eq.s32.totalorder %v38_v18, %v2111_v17 }
  0x7f   :  { %v1661_v20 = vsel %vm42_vm2, 1.0, %v2006_v7  ;;  %v1663_v23 = vsel %vm44_vm3, 1.0, %v2006_v7 }
  0x80   :  { %1770 = vmatprep.mubr.msk.f32.mxu0 %vm62_vm1, %v1661_v20 }
  0x81   :  { %v41_v21 = vpop.permute.xlu1 %40  ;;  %v35_v22 = vpop.permute.xlu0 %34 }
  0x82   :  { %vm43_vm4 = vcmp.eq.s32.totalorder %v35_v22, %v2111_v17  ;;  %vm45_vm5 = vcmp.eq.s32.totalorder %v41_v21, %v2111_v17 }
  0x83   :  { %v1662_v24 = vsel %vm43_vm4, 1.0, %v2006_v7  ;;  %v1664_v25 = vsel %vm45_vm5, 1.0, %v2006_v7 }
  0x84   :  { %1771 = vmatmul.mubr.msk.f32.vlgmr.msra.gmra.mxu0 %vm62_vm1, %v1662_v24 }
  0x85   :  { %1773 = vmatprep.mubr.msk.f32.mxu0 %vm62_vm1, %v1663_v23  ;;  %1812 = vmatpush3.msra.mxu0 %v2136_v34 }
  0x86   :  { %1813 = vmatprep.subr.mxu0 %v2006_v7 }
  0x87   :  { %1814 = vmatpush3.msra.mxu0 %v2150_v41 }
  0x88   :  { %1774 = vmatmul.mubr.msk.f32.gmra.mxu0 %vm62_vm1, %v1664_v25  ;;  %1825 = vmatprep.subr.mxu0 %v2006_v7 }
  0x89   :  { %1815 = vmatprep.mubr.msk.f32.mxu0 %vm2007_vm0, %v2006_v7 }
  0xcb   :  { %v251_v26 = vpop.f32.mrf.mxu1 }
  0xcd   :  { %v1782_v27 = vpop.f32.mrf.mxu1 }
 0x144   :  { %v2123_v28 = vpop.f32.mrf.mxu0 }
 0x146   :  { %v2125_v29 = vpop.f32.mrf.mxu0 }
 0x148   :  { %v2127_v30 = vpop.f32.mrf.mxu0 }
 0x149   :  { %v166_v31 = vrot.slane %v2127_v30, 4 }
 0x14a   :  { %v2187_v8 = vpop.f32.mrf.mxu0 }
 0x14b   :  { %167 = vrot.lane.b32.xlu0 %v166_v31, %s2008_s1  ;;  %v543_v9 = vrot.slane %v2187_v8, 4 }
 0x1bd   :  { %v168_v35 = vpop.permute.xlu0 %167 }
 0x1be   :  { %v2144_v36 = vsel %vm170_vm6, %v2125_v29, %v168_v35 }
 0x1bf   :  { %v252_v37 = vadd.f32 %v251_v26, %v2144_v36  ;;  %v360_v62 = vrot.slane %v2144_v36, 4 }
 0x1c1   :  { %v1669_v38 = vmul.f32 -1.442695, %v252_v37 }
 0x1c3   :  { %1925 = vpow2.f32 %v1669_v38 }
 0x1d0   :  { %v1926_v39 = vpop.eup %1925 }
 0x1d1   :  { %v258_v40 = vadd.f32 1.0, %v1926_v39 }
 0x1d3   :  { %1927 = vrcp.f32 %v258_v40 }
 0x1e0   :  { %v1928_v42 = vpop.eup %1927 }
 0x1e1   :  { %267 = vperm.xlu0 %1899, %v1928_v42   ;;  %263 = vperm.xlu1 %1898, %v1928_v42  }
 0x1e5   :  { %1900 = vset.pattern.permute.xlu0 %v2005_v2  ;;  %173 = vrot.lane.b32.xlu1 %v2125_v29, %s2011_s27 }
 0x1e6   :  { %347 = vperm.xlu0 %1900, %v1928_v42   ;;  %1901 = vset.pattern.permute.xlu1 %v2012_v43 }
 0x1e9   :  { %176 = vrot.lane.b32.xlu1 %v166_v31, %s2013_s3 }
 0x1ea   :  { %1903 = vset.pattern.permute.xlu0 %v2010_v33 }
 0x1ed   :  { %351 = vperm.xlu1 %1901, %v1928_v42  }
 0x1f1   :  { %1902 = vset.pattern.permute.xlu1 %v2009_v32 }
 0x25c   :  { %v268_v44 = vpop.permute.xlu0 %267  ;;  %v264_v45 = vpop.permute.xlu1 %263 }
 0x25d   :  { %v270_v46 = vsel %vm164_vm7, %v264_v45, %v268_v44 }
 0x25e   :  { %v271_v47 = vmul.f32 0.0, %v270_v46 }
 0x260   :  { %1788 = vmatmul.mubr.msk.f32.vlgmr.msra.gmra.mxu1 %vm181_vm8, %v271_v47  ;;  %v174_v48 = vpop.permute.xlu1 %173 }
 0x261   :  { %1791 = vmatpush3.msra.mxu1 %v2082_v10  ;;  %1794 = vmatprep.mubr.msk.f32.mxu1 %vm2007_vm0, %v2006_v7  ;;  %v348_v55 = vpop.permute.xlu0 %347 }
 0x262   :  { %1792 = vmatprep.subr.mxu1 %v2006_v7 }
 0x263   :  { %1793 = vmatpush3.msra.mxu1 %v2087_v11 }
 0x264   :  { %1797 = vmatprep.subr.mxu1 %v2006_v7  ;;  %v177_v49 = vpop.permute.xlu1 %176 }
 0x265   :  { %v180_v50 = vsel %vm179_vm9, %v174_v48, %v177_v49 }
 0x266   :  { %v453_v16 = vrot.slane %v180_v50, 4 }
 0x268   :  { %v352_v54 = vpop.permute.xlu1 %351 }
 0x269   :  { %v354_v56 = vsel %vm164_vm7, %v348_v55, %v352_v54 }
 0x26a   :  { %v355_v57 = vsub.f32 1.0, %v354_v56 }
 0x26c   :  { %v356_v59 = vmul.f32 0.0, %v355_v57 }
 0x320   :  { %v341_v51 = vpop.f32.mrf.mxu1 }
 0x321   :  { %v342_v52 = vadd.f32 %v341_v51, %v180_v50 }
 0x322   :  { %v1789_v53 = vpop.f32.mrf.mxu1 }
 0x323   :  { %1929 = vtanh.f32 %v342_v52 }
 0x330   :  { %v1930_v58 = vpop.eup %1929 }
 0x331   :  { %v357_v60 = vmul.f32 %v1930_v58, %v354_v56 }
 0x333   :  { %v2176_v61 = vadd.f32 %v357_v60, %v356_v59 }
 0x335   :  { %1795 = vmatmul.mubr.msk.f32.vlgmr.msra.gmra.mxu1 %vm181_vm8, %v2176_v61 }
 0x336   :  { %1798 = vmatpush3.msra.mxu1 %v2136_v34  ;;  %1801 = vmatprep.mubr.msk.f32.mxu1 %vm2007_vm0, %v2006_v7 }
 0x337   :  { %1799 = vmatprep.subr.mxu1 %v2006_v7 }
 0x338   :  { %1800 = vmatpush3.msra.mxu1 %v2150_v41 }
 0x339   :  { %1804 = vmatprep.subr.mxu1 %v2006_v7 }
 0x3f5   :  { %v431_v63 = vpop.f32.mrf.mxu1 }
 0x3f6   :  { %v432_v0 = vadd.f32 %v431_v63, %v360_v62 }
 0x3f7   :  { %v1796_v1 = vpop.f32.mrf.mxu1 }
 0x3f8   :  { %v1672_v3 = vmul.f32 -1.442695, %v432_v0 }
 0x3fa   :  { %1931 = vpow2.f32 %v1672_v3 }
 0x407   :  { %v1932_v4 = vpop.eup %1931 }
 0x408   :  { %v438_v5 = vadd.f32 1.0, %v1932_v4 }
 0x40a   :  { %1933 = vrcp.f32 %v438_v5 }
 0x417   :  { %v1934_v6 = vpop.eup %1933 }
 0x418   :  { %447 = vperm.xlu0 %1903, %v1934_v6   ;;  %443 = vperm.xlu1 %1902, %v1934_v6  }
 0x41c   :  { %1904 = vset.pattern.permute.xlu1 %v2005_v2  ;;  %544 = vrot.lane.b32.xlu0 %v543_v9, %s2008_s1 }
 0x41d   :  { %530 = vperm.xlu1 %1904, %v1934_v6  }
 0x421   :  { %1905 = vset.pattern.permute.xlu1 %v2012_v43 }
 0x422   :  { %534 = vperm.xlu1 %1905, %v1934_v6  }
 0x426   :  { %1906 = vset.pattern.permute.xlu1 %v2009_v32 }
 0x493   :  { %v448_v12 = vpop.permute.xlu0 %447  ;;  %v444_v13 = vpop.permute.xlu1 %443 }
 0x494   :  { %v450_v14 = vsel %vm164_vm7, %v444_v13, %v448_v12 }
 0x495   :  { %v451_v15 = vmul.f32 %v450_v14, %v2176_v61  ;;  %v916_v14 = vrot.slane %v2123_v28, 4 }
 0x497   :  { %1802 = vmatmul.mubr.msk.f32.vlgmr.msra.gmra.mxu1 %vm181_vm8, %v451_v15  ;;  %v545_v35 = vpop.permute.xlu0 %544 }
 0x498   :  { %1805 = vmatpush3.msra.mxu1 %v2082_v10  ;;  %1808 = vmatprep.mubr.msk.f32.mxu1 %vm2007_vm0, %v2006_v7  ;;  %v531_v19 = vpop.permute.xlu1 %530  ;;  %v547_v36 = vsel %vm170_vm6, %v2123_v28, %v545_v35 }
 0x499   :  { %1806 = vmatprep.subr.mxu1 %v2006_v7  ;;  %v734_v1 = vrot.slane %v547_v36, 4 }
 0x49a   :  { %1807 = vmatpush3.msra.mxu1 %v2087_v11 }
 0x49b   :  { %1818 = vmatprep.subr.mxu1 %v2006_v7 }
 0x49d   :  { %v535_v22 = vpop.permute.xlu1 %534 }
 0x49e   :  { %v537_v23 = vsel %vm164_vm7, %v531_v19, %v535_v22 }
 0x49f   :  { %v538_v24 = vsub.f32 1.0, %v537_v23 }
 0x4a1   :  { %v539_v26 = vmul.f32 %v538_v24, %v2176_v61 }
 0x557   :  { %v524_v18 = vpop.f32.mrf.mxu1 }
 0x558   :  { %v525_v20 = vadd.f32 %v524_v18, %v453_v16 }
 0x559   :  { %v1803_v21 = vpop.f32.mrf.mxu1 }
 0x55a   :  { %1935 = vtanh.f32 %v525_v20 }
 0x567   :  { %v1936_v25 = vpop.eup %1935 }
 0x568   :  { %v540_v27 = vmul.f32 %v1936_v25, %v537_v23 }
 0x56a   :  { %v2207_v31 = vadd.f32 %v540_v27, %v539_v26 }
 0x56c   :  { %1809 = vmatmul.mubr.msk.f32.vlgmr.msra.gmra.mxu1 %vm181_vm8, %v2207_v31 }
 0x56d   :  { %1819 = vmatpush3.msra.mxu1 %v2082_v10  ;;  %1822 = vmatprep.mubr.msk.f32.mxu1 %vm2007_vm0, %v2006_v7 }
 0x56e   :  { %1820 = vmatprep.subr.mxu1 %v2006_v7 }
 0x56f   :  { %1821 = vmatpush3.msra.mxu1 %v2087_v11 }
 0x570   :  { %1832 = vmatprep.subr.mxu1 %v2006_v7 }
 0x62c   :  { %v625_v37 = vpop.f32.mrf.mxu1 }
 0x62d   :  { %v626_v38 = vadd.f32 %v625_v37, %v547_v36 }
 0x62e   :  { %v1810_v39 = vpop.f32.mrf.mxu1 }
 0x62f   :  { %v1675_v40 = vmul.f32 -1.442695, %v626_v38 }
 0x631   :  { %1937 = vpow2.f32 %v1675_v40 }
 0x63e   :  { %v1938_v42 = vpop.eup %1937 }
 0x63f   :  { %v632_v44 = vadd.f32 1.0, %v1938_v42 }
 0x641   :  { %1939 = vrcp.f32 %v632_v44 }
 0x64e   :  { %v1940_v45 = vpop.eup %1939 }
 0x64f   :  { %641 = vperm.xlu0 %1903, %v1940_v45   ;;  %637 = vperm.xlu1 %1906, %v1940_v45  }
 0x653   :  { %552 = vrot.lane.b32.xlu0 %v543_v9, %s2013_s3  ;;  %549 = vrot.lane.b32.xlu1 %v2123_v28, %s2011_s27 }
 0x654   :  { %1908 = vset.pattern.permute.xlu0 %v2012_v43  ;;  %1907 = vset.pattern.permute.xlu1 %v2005_v2 }
 0x657   :  { %725 = vperm.xlu0 %1908, %v1940_v45   ;;  %721 = vperm.xlu1 %1907, %v1940_v45  }
 0x65b   :  { %1911 = vset.pattern.permute.xlu0 %v2005_v2  ;;  %1909 = vset.pattern.permute.xlu1 %v2009_v32 }
 0x6ca   :  { %v642_v46 = vpop.permute.xlu0 %641  ;;  %v638_v47 = vpop.permute.xlu1 %637 }
 0x6cb   :  { %v644_v48 = vsel %vm164_vm7, %v638_v47, %v642_v46 }
 0x6cc   :  { %v645_v49 = vmul.f32 %v644_v48, %v2207_v31 }
 0x6ce   :  { %1816 = vmatmul.mubr.msk.f32.vlgmr.msra.gmra.mxu0 %vm181_vm8, %v645_v49  ;;  %v553_v50 = vpop.permute.xlu0 %552  ;;  %v550_v51 = vpop.permute.xlu1 %549 }
 0x6cf   :  { %1826 = vmatpush3.msra.mxu0 %v2136_v34  ;;  %1829 = vmatprep.mubr.msk.f32.mxu0 %vm2007_vm0, %v2006_v7  ;;  %v555_v52 = vsel %vm179_vm9, %v550_v51, %v553_v50 }
 0x6d0   :  { %1827 = vmatprep.subr.mxu0 %v2006_v7  ;;  %v827_v28 = vrot.slane %v555_v52, 4 }
 0x6d1   :  { %1828 = vmatpush3.msra.mxu0 %v2150_v41 }
 0x6d2   :  { %1839 = vmatprep.subr.mxu0 %v2006_v7  ;;  %v726_v56 = vpop.permute.xlu0 %725  ;;  %v722_v57 = vpop.permute.xlu1 %721 }
 0x6d3   :  { %v728_v58 = vsel %vm164_vm7, %v722_v57, %v726_v56 }
 0x6d4   :  { %v729_v59 = vsub.f32 1.0, %v728_v58 }
 0x6d6   :  { %v730_v62 = vmul.f32 %v729_v59, %v2207_v31 }
 0x78e   :  { %v715_v53 = vpop.f32.mrf.mxu0 }
 0x78f   :  { %v716_v54 = vadd.f32 %v715_v53, %v555_v52 }
 0x790   :  { %v1817_v55 = vpop.f32.mrf.mxu0 }
 0x791   :  { %1941 = vtanh.f32 %v716_v54 }
 0x79e   :  { %v1942_v60 = vpop.eup %1941 }
 0x79f   :  { %v731_v63 = vmul.f32 %v1942_v60, %v728_v58 }
 0x7a1   :  { %v2240_v0 = vadd.f32 %v731_v63, %v730_v62 }
 0x7a3   :  { %1823 = vmatmul.mubr.msk.f32.vlgmr.msra.gmra.mxu1 %vm181_vm8, %v2240_v0 }
 0x7a4   :  { %1833 = vmatpush3.msra.mxu1 %v2082_v10  ;;  %1836 = vmatprep.mubr.msk.f32.mxu1 %vm2007_vm0, %v2006_v7 }
 0x7a5   :  { %1834 = vmatprep.subr.mxu1 %v2006_v7 }
 0x7a6   :  { %1835 = vmatpush3.msra.mxu1 %v2087_v11 }
 0x7a7   :  { %1846 = vmatprep.subr.mxu1 %v2006_v7 }
 0x863   :  { %v805_v3 = vpop.f32.mrf.mxu1 }
 0x864   :  { %v806_v4 = vadd.f32 %v805_v3, %v734_v1 }
 0x865   :  { %v1824_v5 = vpop.f32.mrf.mxu1 }
 0x866   :  { %v1678_v6 = vmul.f32 -1.442695, %v806_v4 }
 0x868   :  { %1943 = vpow2.f32 %v1678_v6 }
 0x875   :  { %v1944_v9 = vpop.eup %1943 }
 0x876   :  { %v812_v12 = vadd.f32 1.0, %v1944_v9 }
 0x878   :  { %1945 = vrcp.f32 %v812_v12 }
 0x885   :  { %v1946_v13 = vpop.eup %1945 }
 0x886   :  { %904 = vperm.xlu0 %1911, %v1946_v13   ;;  %817 = vperm.xlu1 %1909, %v1946_v13  }
 0x88a   :  { %1910 = vset.pattern.permute.xlu1 %v2010_v33  ;;  %1913 = vset.pattern.permute.xlu0 %v2009_v32 }
 0x88b   :  { %821 = vperm.xlu1 %1910, %v1946_v13  }
 0x88f   :  { %1912 = vset.pattern.permute.xlu1 %v2012_v43 }
 0x890   :  { %908 = vperm.xlu1 %1912, %v1946_v13  }
 0x894   :  { %917 = vrot.lane.b32.xlu1 %v916_v14, %s2008_s1 }
 0x895   :  { %1914 = vset.pattern.permute.xlu1 %v2010_v33 }
 0x901   :  { %v818_v15 = vpop.permute.xlu1 %817  ;;  %v905_v24 = vpop.permute.xlu0 %904 }
 0x906   :  { %v822_v16 = vpop.permute.xlu1 %821 }
 0x907   :  { %v824_v18 = vsel %vm164_vm7, %v818_v15, %v822_v16 }
 0x908   :  { %v825_v19 = vmul.f32 %v824_v18, %v2240_v0 }
 0x90a   :  { %1830 = vmatmul.mubr.msk.f32.vlgmr.msra.gmra.mxu0 %vm181_vm8, %v825_v19 }
 0x90b   :  { %1840 = vmatpush3.msra.mxu0 %v2136_v34  ;;  %1843 = vmatprep.mubr.msk.f32.mxu0 %vm2007_vm0, %v2006_v7  ;;  %v909_v23 = vpop.permute.xlu1 %908 }
 0x90c   :  { %1841 = vmatprep.subr.mxu0 %v2006_v7  ;;  %v911_v25 = vsel %vm164_vm7, %v905_v24, %v909_v23 }
 0x90d   :  { %1842 = vmatpush3.msra.mxu0 %v2150_v41  ;;  %v912_v26 = vsub.f32 1.0, %v911_v25 }
 0x90e   :  { %1853 = vmatprep.subr.mxu0 %v2006_v7 }
 0x90f   :  { %v913_v35 = vmul.f32 %v912_v26, %v2240_v0  ;;  %v918_v38 = vpop.permute.xlu1 %917  ;;  %v1477_v26 = vrot.slane %v2176_v61, 4 }
 0x910   :  { %v920_v39 = vsel %vm170_vm6, %v2187_v8, %v918_v38 }
 0x911   :  { %v1106_v5 = vrot.slane %v920_v39, 4  ;;  %v1487_v38 = vsel %vm1486_vm10, 0.0, %v1477_v26 }
 0x9ca   :  { %v898_v20 = vpop.f32.mrf.mxu0 }
 0x9cb   :  { %v899_v21 = vadd.f32 %v898_v20, %v827_v28 }
 0x9cc   :  { %v1831_v22 = vpop.f32.mrf.mxu0 }
 0x9cd   :  { %1947 = vtanh.f32 %v899_v21 }
 0x9da   :  { %v1948_v27 = vpop.eup %1947 }
 0x9db   :  { %v914_v36 = vmul.f32 %v1948_v27, %v911_v25 }
 0x9dd   :  { %v2269_v37 = vadd.f32 %v914_v36, %v913_v35  ;;  %v1491_v35 = vld [vmem:[%s2382_s4] sm:$0xff]  ;;  %v1479_v36 = vrot.slane %v2240_v0, 4 }
 0x9df   :  { %1837 = vmatmul.mubr.msk.f32.vlgmr.msra.gmra.mxu1 %vm181_vm8, %v2269_v37  ;;  %v1488_v61 = vsel %vm1486_vm10, %v2207_v31, %v1479_v36 }
 0x9e0   :  { %1847 = vmatpush3.msra.mxu1 %v2082_v10  ;;  %1850 = vmatprep.mubr.msk.f32.mxu1 %vm2007_vm0, %v2006_v7 }
 0x9e1   :  { %1848 = vmatprep.subr.mxu1 %v2006_v7 }
 0x9e2   :  { %1849 = vmatpush3.msra.mxu1 %v2087_v11 }
 0x9e3   :  { %1860 = vmatprep.subr.mxu1 %v2006_v7 }
 0xa9f   :  { %v997_v40 = vpop.f32.mrf.mxu1 }
 0xaa0   :  { %v998_v42 = vadd.f32 %v997_v40, %v920_v39 }
 0xaa1   :  { %v1838_v44 = vpop.f32.mrf.mxu1 }
 0xaa2   :  { %v1681_v45 = vmul.f32 -1.442695, %v998_v42 }
 0xaa4   :  { %1949 = vpow2.f32 %v1681_v45 }
 0xab1   :  { %v1950_v46 = vpop.eup %1949 }
 0xab2   :  { %v1004_v47 = vadd.f32 1.0, %v1950_v46 }
 0xab4   :  { %1951 = vrcp.f32 %v1004_v47 }
 0xac1   :  { %v1952_v48 = vpop.eup %1951 }
 0xac2   :  { %1013 = vperm.xlu1 %1914, %v1952_v48   ;;  %1009 = vperm.xlu0 %1913, %v1952_v48  }
 0xac6   :  { %921 = vrot.lane.b32.xlu1 %v2187_v8, %s2011_s27  ;;  %924 = vrot.lane.b32.xlu0 %v916_v14, %s2013_s3 }
 0xac7   :  { %1915 = vset.pattern.permute.xlu1 %v2005_v2  ;;  %1916 = vset.pattern.permute.xlu0 %v2012_v43 }
 0xaca   :  { %1093 = vperm.xlu1 %1915, %v1952_v48   ;;  %1097 = vperm.xlu0 %1916, %v1952_v48  }
 0xace   :  { %1917 = vset.pattern.permute.xlu1 %v2009_v32  ;;  %1919 = vset.pattern.permute.xlu0 %v2005_v2 }
 0xb3d   :  { %v1014_v49 = vpop.permute.xlu1 %1013  ;;  %v1010_v50 = vpop.permute.xlu0 %1009 }
 0xb3e   :  { %v1016_v51 = vsel %vm164_vm7, %v1010_v50, %v1014_v49  ;;  %v1689_v50 = vld [vmem:[%s2383_s5] ss:$0 sm:$0xff]  ;;  %s2014_s5 = smov [#allocation2]  }
 0xb3f   :  { %v1017_v52 = vmul.f32 %v1016_v51, %v2269_v37  ;;  %s1650_s9 = sshll.u32 %s2014_s5, 4  ;;  %s1651_s9 = int_to_ptr.vmem [resolvable:$true] %s1650_s9 }
 0xb40   :  { %s1983_s10 = scalar_lea.vmem %s1651_s9, 512  ;;  %p1988_p1 = scmp.lt.s32.totalorder %s1651_s9, %s1651_s9 }
 0xb41   :  { %1844 = vmatmul.mubr.msk.f32.vlgmr.msra.gmra.mxu0 %vm181_vm8, %v1017_v52  ;;  %v922_v8 = vpop.permute.xlu1 %921  ;;  %v925_v53 = vpop.permute.xlu0 %924  ;;  %p1984_p0 = scmp.ne.s32.totalorder %s1651_s9, %s1983_s10  ;;  %p1989_p2 = scmp.lt.s32.totalorder %s1983_s10, %s1983_s10 }
 0xb42   :  { %1854 = vmatpush3.msra.mxu0 %v2136_v34  ;;  %1857 = vmatprep.mubr.msk.f32.mxu0 %vm2007_vm0, %v2006_v7  ;;  %v927_v54 = vsel %vm179_vm9, %v922_v8, %v925_v53 }
 0xb43   :  { %1855 = vmatprep.subr.mxu0 %v2006_v7  ;;  %p1990_p3 = por %p1989_p2, %p1988_p1 }
 0xb44   :  { %1856 = vmatpush3.msra.mxu0 %v2150_v41 }
 0xb45   :  { %1867 = vmatprep.subr.mxu0 %v2006_v7  ;;  %v1094_v58 = vpop.permute.xlu1 %1093  ;;  %v1098_v59 = vpop.permute.xlu0 %1097  ;;  %p1991_p4 = pnand %p1990_p3, %p1984_p0 }
 0xb46   :  { %v1100_v60 = vsel %vm164_vm7, %v1094_v58, %v1098_v59 }
 0xb47   :  { %v1101_v62 = vsub.f32 1.0, %v1100_v60 }
 0xb49   :  { %v1102_v1 = vmul.f32 %v1101_v62, %v2269_v37 }
 0xc01   :  { %v1087_v55 = vpop.f32.mrf.mxu0 }
 0xc02   :  { %v1088_v56 = vadd.f32 %v1087_v55, %v927_v54 }
 0xc03   :  { %v1845_v57 = vpop.f32.mrf.mxu0 }
 0xc04   :  { %1953 = vtanh.f32 %v1088_v56 }
 0xc11   :  { %v1954_v63 = vpop.eup %1953 }
 0xc12   :  { %v1103_v3 = vmul.f32 %v1954_v63, %v1100_v60 }
 0xc14   :  { %v2302_v4 = vadd.f32 %v1103_v3, %v1102_v1 }
 0xc16   :  { %1851 = vmatmul.mubr.msk.f32.vlgmr.msra.gmra.mxu1 %vm181_vm8, %v2302_v4  ;;  %v1481_v39 = vrot.slane %v2302_v4, 4 }
 0xc17   :  { %1861 = vmatpush3.msra.mxu1 %v2082_v10  ;;  %1864 = vmatprep.mubr.msk.f32.mxu1 %vm2007_vm0, %v2006_v7  ;;  %v1288_v10 = vrot.slane %v2125_v29, 4  ;;  %v1492_v29 = vld [vmem:[%s2382_s4 + $0x8] sm:$0xff] }
 0xc18   :  { %1862 = vmatprep.subr.mxu1 %v2006_v7  ;;  %v1489_v40 = vsel %vm1486_vm10, %v2269_v37, %v1481_v39 }
 0xc19   :  { %1863 = vmatpush3.msra.mxu1 %v2087_v11 }
 0xc1a   :  { %1874 = vmatprep.subr.mxu1 %v1492_v29 }
 0xcd6   :  { %v1177_v6 = vpop.f32.mrf.mxu1 }
 0xcd7   :  { %v1178_v9 = vadd.f32 %v1177_v6, %v1106_v5 }
 0xcd8   :  { %v1852_v12 = vpop.f32.mrf.mxu1 }
 0xcd9   :  { %v1684_v13 = vmul.f32 -1.442695, %v1178_v9 }
 0xcdb   :  { %1955 = vpow2.f32 %v1684_v13 }
 0xce8   :  { %v1956_v14 = vpop.eup %1955 }
 0xce9   :  { %v1184_v15 = vadd.f32 1.0, %v1956_v14 }
 0xceb   :  { %1957 = vrcp.f32 %v1184_v15 }
 0xcf8   :  { %v1958_v16 = vpop.eup %1957 }
 0xcf9   :  { %1276 = vperm.xlu0 %1919, %v1958_v16   ;;  %1189 = vperm.xlu1 %1917, %v1958_v16  }
 0xcfd   :  { %1918 = vset.pattern.permute.xlu1 %v2010_v33  ;;  %1921 = vset.pattern.permute.xlu0 %v2009_v32  ;;  %v1199_v32 = vrot.slane %v927_v54, 4 }
 0xcfe   :  { %1193 = vperm.xlu1 %1918, %v1958_v16  }
 0xd02   :  { %1920 = vset.pattern.permute.xlu1 %v2012_v43 }
 0xd03   :  { %1280 = vperm.xlu1 %1920, %v1958_v16  }
 0xd07   :  { %1289 = vrot.lane.b32.xlu1 %v1288_v10, %s2008_s1 }
 0xd08   :  { %1922 = vset.pattern.permute.xlu1 %v2010_v33 }
 0xd74   :  { %v1190_v11 = vpop.permute.xlu1 %1189  ;;  %v1277_v23 = vpop.permute.xlu0 %1276 }
 0xd79   :  { %v1194_v18 = vpop.permute.xlu1 %1193 }
 0xd7a   :  { %v1196_v19 = vsel %vm164_vm7, %v1190_v11, %v1194_v18 }
 0xd7b   :  { %v1197_v28 = vmul.f32 %v1196_v19, %v2302_v4 }
 0xd7d   :  { %1858 = vmatmul.mubr.msk.f32.vlgmr.msra.gmra.mxu0 %vm181_vm8, %v1197_v28 }
 0xd7e   :  { %1868 = vmatpush3.msra.mxu0 %v2136_v34  ;;  %1871 = vmatprep.mubr.msk.f32.mxu0 %vm2007_vm0, %v2006_v7  ;;  %v1281_v22 = vpop.permute.xlu1 %1280 }
 0xd7f   :  { %1869 = vmatprep.subr.mxu0 %v2006_v7  ;;  %v1283_v34 = vsel %vm164_vm7, %v1277_v23, %v1281_v22 }
 0xd80   :  { %1870 = vmatpush3.msra.mxu0 %v2150_v41  ;;  %v1284_v24 = vsub.f32 1.0, %v1283_v34 }
 0xd82   :  { %v1285_v7 = vmul.f32 %v1284_v24, %v2302_v4  ;;  %v1290_v0 = vpop.permute.xlu1 %1289 }
 0xd83   :  { %v1292_v42 = vsel %vm170_vm6, %v2127_v30, %v1290_v0 }
 0xe3d   :  { %v1270_v33 = vpop.f32.mrf.mxu0 }
 0xe3e   :  { %v1271_v20 = vadd.f32 %v1270_v33, %v1199_v32 }
 0xe3f   :  { %v1859_v21 = vpop.f32.mrf.mxu0 }
 0xe40   :  { %1959 = vtanh.f32 %v1271_v20 }
 0xe4d   :  { %v1960_v25 = vpop.eup %1959 }
 0xe4e   :  { %v1286_v41 = vmul.f32 %v1960_v25, %v1283_v34 }
 0xe50   :  { %v1287_v27 = vadd.f32 %v1286_v41, %v1285_v7 }
 0xe52   :  { %1865 = vmatmul.mubr.msk.f32.vlgmr.msra.gmra.mxu1 %vm181_vm8, %v1287_v27 }
 0xe53   :  { %1875 = vmatpush3.msra.mxu1 %v1492_v29  ;;  %1878 = vmatprep.mubr.msk.f32.mxu1 %vm181_vm8, %v1487_v38 }
 0xe54   :  { %1876 = vmatprep.subr.mxu1 %v1491_v35 }
 0xe55   :  { %1877 = vmatpush3.msra.mxu1 %v1491_v35 }
 0xe56   :  { %1879 = vmatmul.mubr.msk.f32.vlgmr.msra.gmra.mxu1 %vm181_vm8, %v1488_v61 }
 0xe57   :  { %1881 = vmatprep.mubr.msk.f32.mxu1 %vm181_vm8, %v1489_v40 }
 0xf12   :  { %v1369_v44 = vpop.f32.mrf.mxu1 }
 0xf13   :  { %v1370_v45 = vadd.f32 %v1369_v44, %v1292_v42 }
 0xf14   :  { %v1866_v46 = vpop.f32.mrf.mxu1 }
 0xf15   :  { %v1687_v47 = vmul.f32 -1.442695, %v1370_v45 }
 0xf16   :  { %v1880_v37 = vpop.f32.mrf.mxu1 }
 0xf17   :  { %1961 = vpow2.f32 %v1687_v47  ;;  %v2357_v51 = vadd.f32 %v1880_v37, %v1689_v50 }
 0xf18   :  { %v1578_v52 = vpop.f32.mrf.mxu1 }
 0xf19   :  { %v2360_v8 = vadd.f32 %v1689_v50, %v1578_v52 }
 0xf24   :  { %v1962_v48 = vpop.eup %1961 }
 0xf25   :  { %v1376_v49 = vadd.f32 1.0, %v1962_v48 }
 0xf27   :  { %1963 = vrcp.f32 %v1376_v49 }
 0xf34   :  { %v1964_v31 = vpop.eup %1963 }
 0xf35   :  { %1385 = vperm.xlu1 %1922, %v1964_v31   ;;  %1381 = vperm.xlu0 %1921, %v1964_v31  }
 0xf39   :  { %1293 = vrot.lane.b32.xlu1 %v2127_v30, %s2011_s27  ;;  %1296 = vrot.lane.b32.xlu0 %v1288_v10, %s2013_s3 }
 0xf3a   :  { %1923 = vset.pattern.permute.xlu1 %v2005_v2  ;;  %1924 = vset.pattern.permute.xlu0 %v2012_v43 }
 0xf3d   :  { %1465 = vperm.xlu1 %1923, %v1964_v31   ;;  %1469 = vperm.xlu0 %1924, %v1964_v31  }
 0xf5c   :  { %1599 = vmax.xlane.f32.xlu0 %v2357_v51 }
 0xf61   :  { %1597 = vmax.xlane.f32.xlu1 %v2360_v8 }
 0xfb0   :  { %v1386_v30 = vpop.permute.xlu1 %1385  ;;  %v1382_v2 = vpop.permute.xlu0 %1381 }
 0xfb1   :  { %v1388_v43 = vsel %vm164_vm7, %v1382_v2, %v1386_v30 }
 0xfb2   :  { %v1389_v53 = vmul.f32 %v1388_v43, %v1287_v27 }
 0xfb4   :  { %1872 = vmatmul.mubr.msk.f32.vlgmr.msra.gmra.mxu0 %vm181_vm8, %v1389_v53  ;;  %v1294_v54 = vpop.permute.xlu1 %1293  ;;  %v1297_v55 = vpop.permute.xlu0 %1296 }
 0xfb5   :  { %v1299_v56 = vsel %vm179_vm9, %v1294_v54, %v1297_v55 }
 0xfb8   :  { %v1466_v60 = vpop.permute.xlu1 %1465  ;;  %v1470_v62 = vpop.permute.xlu0 %1469 }
 0xfb9   :  { %v1472_v63 = vsel %vm164_vm7, %v1466_v60, %v1470_v62 }
 0xfba   :  { %v1473_v1 = vsub.f32 1.0, %v1472_v63 }
 0xfbc   :  { %v1474_v4 = vmul.f32 %v1473_v1, %v1287_v27 }
 0xfe5   :  { %v1600_v13 = vpop.xlane.xlu0 %1599 }
 0xfe6   :  { %v1606_v15 = vsub.f32 %v2357_v51, %v1600_v13 }
 0xfe8   :  { %v1611_v10 = vmul.f32 1.442695, %v1606_v15 }
 0xfea   :  { %v1598_v14 = vpop.xlane.xlu1 %1597 }
 0xfeb   :  { %v1605_v16 = vsub.f32 %v2360_v8, %v1598_v14 }
 0xfed   :  { %v1609_v11 = vmul.f32 1.442695, %v1605_v16 }
0x1074   :  { %v1459_v57 = vpop.f32.mrf.mxu0 }
0x1075   :  { %v1460_v58 = vadd.f32 %v1459_v57, %v1299_v56 }
0x1076   :  { %v1873_v59 = vpop.f32.mrf.mxu0 }
0x1077   :  { %1965 = vtanh.f32 %v1460_v58 }
0x1078   :  { %1967 = vpow2.f32 %v1611_v10 }
0x1079   :  { %1969 = vpow2.f32 %v1609_v11 }
0x1084   :  { %v1966_v3 = vpop.eup %1965 }
0x1085   :  { %v1475_v5 = vmul.f32 %v1966_v3, %v1472_v63  ;;  %v1968_v29 = vpop.eup %1967 }
0x1086   :  { %v1970_v32 = vpop.eup %1969 }
0x1087   :  { %v1476_v6 = vadd.f32 %v1475_v5, %v1474_v4 }
0x1089   :  { %v1484_v9 = vrot.slane %v1476_v6, 4 }
0x108b   :  { %v1490_v12 = vsel %vm1486_vm10, %v1287_v27, %v1484_v9 }
0x108c   :  { %1882 = vmatmul.mubr.msk.f32.gmra.mxu1 %vm181_vm8, %v1490_v12 }
0x114c   :  { %v1883_v17 = vpop.f32.mrf.mxu1 }
0x114d   :  { %v1594_v18 = vadd.f32 %v1883_v17, %v1689_v50 }
0x114e   :  { %v1588_v19 = vpop.f32.mrf.mxu1 }
0x114f   :  { %v1589_v28 = vadd.f32 %v1689_v50, %v1588_v19  ;;  %1603 = vmax.xlane.f32.xlu0 %v1594_v18 }
0x1151   :  { %1601 = vmax.xlane.f32.xlu1 %v1589_v28 }
0x1153   :  { %1619 = vadd.xlane.f32.xlu0 %v1968_v29 }
0x1155   :  { %1617 = vadd.xlane.f32.xlu1 %v1970_v32 }
0x11d8   :  { %v1604_v33 = vpop.xlane.xlu0 %1603 }
0x11d9   :  { %v1608_v20 = vsub.f32 %v1594_v18, %v1604_v33 }
0x11da   :  { %v1602_v21 = vpop.xlane.xlu1 %1601 }
0x11db   :  { %v1615_v22 = vmul.f32 1.442695, %v1608_v20  ;;  %v1607_v23 = vsub.f32 %v1589_v28, %v1602_v21 }
0x11dc   :  { %v1620_v34 = vpop.xlane.xlu0 %1619 }
0x11dd   :  { %1971 = vpow2.f32 %v1615_v22  ;;  %v1613_v24 = vmul.f32 1.442695, %v1607_v23 }
0x11de   :  { %1973 = vlog2.f32 %v1620_v34  ;;  %v1618_v25 = vpop.xlane.xlu1 %1617 }
0x11df   :  { %1975 = vpow2.f32 %v1613_v24 }
0x11e0   :  { %1977 = vlog2.f32 %v1618_v25 }
0x11ea   :  { %v1972_v7 = vpop.eup %1971 }
0x11eb   :  { %v1974_v41 = vpop.eup %1973  ;;  %1623 = vadd.xlane.f32.xlu0 %v1972_v7 }
0x11ec   :  { %v1976_v26 = vpop.eup %1975  ;;  %v1628_v27 = vmul.f32 0.6931472, %v1974_v41 }
0x11ed   :  { %v1978_v35 = vpop.eup %1977  ;;  %1621 = vadd.xlane.f32.xlu1 %v1976_v26 }
0x11ee   :  { %v1634_v36 = vadd.f32 %v1628_v27, %v1600_v13  ;;  %v1626_v38 = vmul.f32 0.6931472, %v1978_v35 }
0x11f0   :  { %v1638_v39 = vsub.f32 %v2357_v51, %v1634_v36  ;;  %v1633_v61 = vadd.f32 %v1626_v38, %v1598_v14 }
0x11f2   :  { %1642 = vst [vmem:[#allocation2 + $0x8] sm:$0xff] %v1638_v39  ;;  %v1637_v40 = vsub.f32 %v2360_v8, %v1633_v61 }
0x11f4   :  { %1641 = vst [vmem:[#allocation2] sm:$0xff] %v1637_v40 }
0x1274   :  { %v1624_v0 = vpop.xlane.xlu0 %1623 }
0x1275   :  { %1979 = vlog2.f32 %v1624_v0 }
0x1276   :  { %v1622_v42 = vpop.xlane.xlu1 %1621 }
0x1277   :  { %1981 = vlog2.f32 %v1622_v42 }
0x1282   :  { %v1980_v44 = vpop.eup %1979 }
0x1283   :  { %v1632_v45 = vmul.f32 0.6931472, %v1980_v44 }
0x1284   :  { %v1982_v46 = vpop.eup %1981 }
0x1285   :  { %v1636_v47 = vadd.f32 %v1632_v45, %v1604_v33  ;;  %v1630_v48 = vmul.f32 0.6931472, %v1982_v46 }
0x1287   :  { %v1640_v49 = vsub.f32 %v1594_v18, %v1636_v47  ;;  %v1635_v31 = vadd.f32 %v1630_v48, %v1602_v21 }
0x1289   :  { %1644 = vst [vmem:[#allocation2 + $0x18] sm:$0xff] %v1640_v49  ;;  %v1639_v37 = vsub.f32 %v1589_v28, %v1635_v31 }
0x128b   :  { %1643 = vst [vmem:[#allocation2 + $0x10] sm:$0xff] %v1639_v37 }
0x128c   :  { %1994 = shalt.err (!%p1991_p4)
}
0x128d   :  { %s2015_s11 = smov 128   ;;  %s2016_s12 = smov 8  }
0x128e   :  { %1656 = dma.vmem_to_hbm [thread:$0]  %s1651_s9, 512, %s2384_s6, [#allocation3], %s2015_s11, %s2015_s11, %s2016_s12  }
0x128f   :  { %2003 = dma.done.wait [#allocation3], 512  }
0x1290   :  { %2004 = vsyncadd [#allocation3], 4294966784 }
0x1291   :  { %1660 = vsyncpa [#allocation3], 1 }

</bundles_post_ra>
